<compile_context>
chip_gen: v6e
topology: v6e:2x2x1
jax: 0.10.0
libtpu: 0.0.40
codegen_flags: <defaults>
</compile_context>

<pallas_src>
import functools

import jax
import jax.numpy as jnp
from jax.experimental import pallas as pl
from jax.experimental.pallas import tpu as pltpu


# ---------------------------------------------------------------------------
# Elementwise-func detection (correctness gate for the Pallas hot path).
# ---------------------------------------------------------------------------
_ELEMENTWISE_PRIMS = frozenset({
    "abs", "add", "and", "atan2", "cbrt", "ceil", "clamp",
    "convert_element_type", "copy", "cos", "cosh", "div", "eq", "erf",
    "erfc", "erf_inv", "exp", "exp2", "expm1", "floor", "ge", "gt",
    "integer_pow", "is_finite", "le", "log", "log1p", "logistic", "lt",
    "max", "min", "mul", "ne", "neg", "nextafter", "not", "or", "pow",
    "rem", "round", "rsqrt", "select_n", "sign", "sin", "sinh", "sqrt",
    "square", "stop_gradient", "sub", "tan", "tanh", "xor",
    "shift_left", "shift_right_arithmetic", "shift_right_logical",
})
_TRANSPARENT_CALLS = frozenset({
    "pjit", "closed_call", "core_call", "custom_jvp_call",
    "custom_vjp_call", "custom_jvp_call_jaxpr", "custom_vjp_call_jaxpr",
    "remat", "checkpoint",
})


def _iter_sub_jaxprs(params):
    for v in params.values():
        for item in (v if isinstance(v, (tuple, list)) else (v,)):
            if hasattr(item, "eqns"):
                yield item
            elif hasattr(item, "jaxpr") and hasattr(item.jaxpr, "eqns"):
                yield item.jaxpr


def _jaxpr_is_elementwise(jaxpr):
    for eqn in jaxpr.eqns:
        name = eqn.primitive.name
        if name in _ELEMENTWISE_PRIMS:
            continue
        if name == "broadcast_in_dim":
            # Only scalar -> full-shape broadcasts keep per-element semantics.
            if tuple(eqn.invars[0].aval.shape) == ():
                continue
            return False
        subs = list(_iter_sub_jaxprs(eqn.params))
        if name in _TRANSPARENT_CALLS and subs:
            if all(_jaxpr_is_elementwise(s) for s in subs):
                continue
        return False
    return True


def _is_safe_elementwise(func, x):
    """True iff func is shape/dtype preserving AND built only from
    elementwise primitives with scalar-only closure constants, so per-tile
    application on a flattened view is bit-identical to applying it on the
    original NCHW tensor."""
    try:
        closed = jax.make_jaxpr(func)(x)
        out_avals = closed.out_avals
        if len(out_avals) != 1:
            return False
        (oa,) = out_avals
        if tuple(oa.shape) != tuple(jnp.shape(x)) or oa.dtype != x.dtype:
            return False
        # Closed-over non-scalar constants (e.g. `x * weight_array`) would
        # mis-broadcast against a flattened tile -> reject.
        if any(jnp.ndim(c) != 0 for c in closed.consts):
            return False
        return _jaxpr_is_elementwise(closed.jaxpr)
    except Exception:
        return False


# ---------------------------------------------------------------------------
# Pallas elementwise kernel.
# ---------------------------------------------------------------------------
def _elementwise_kernel(func):
    def kernel(x_ref, o_ref):
        o_ref[...] = func(x_ref[...]).astype(o_ref.dtype)
    return kernel


# Minimum sublane multiple per itemsize (packed dtypes pack along sublanes).
_SUBLANE = {1: 32, 2: 16, 4: 8, 8: 8}
_LANE_CHOICES = (512, 256, 128)          # lane-dense widths (multiples of 128)
_MIN_SPLIT_BLOCK_BYTES = 512 * 1024      # don't force-split below ~512 KiB/block
_DEFAULT_MIN_PALLAS_BYTES = 1 << 20      # <1 MiB: XLA's fused loop already wins


@functools.lru_cache(maxsize=1)
def _chip_config():
    """Returns (target_block_bytes, num_tensorcores, vmem_limit_bytes|None)."""
    kind = ""
    try:
        kind = jax.devices()[0].device_kind.lower()
    except Exception:
        pass
    if "v7" in kind:
        # v7x: 2 TCs/chip, 64 MiB physical VMEM (32 MiB scoped default).
        # 4 MiB blocks -> 16 MiB live double-buffered; explicit cap as guard.
        return 4 * 1024 * 1024, 2, 32 * 1024 * 1024
    if "v6" in kind:
        # v6e: 1 TC, 32 MiB scoped default, 128 MiB physical.
        return 4 * 1024 * 1024, 1, 32 * 1024 * 1024
    # v5e (16 MiB scoped default) and unknown generations: conservative.
    return 2 * 1024 * 1024, 1, None


def _lambda_elementwise_pallas(func, x):
    """Apply a verified-elementwise func with a tiled, pipelined Pallas kernel."""
    orig_shape = x.shape
    total = x.size
    if total == 0:
        return func(x)

    dtype = x.dtype
    itemsize = jnp.dtype(dtype).itemsize
    sub = _SUBLANE.get(itemsize, 8)
    block_bytes, num_tc, vmem_limit = _chip_config()

    flat = x.reshape(-1)                 # metadata-only flatten

    # Adaptive lane width: largest lane-dense width dividing the element
    # count -> zero padding and zero extra HBM passes (the common case).
    lane = next((l for l in _LANE_CHOICES if total % l == 0), None)
    if lane is None:
        # Non-divisible size: run the 128-aligned prefix through Pallas and
        # the (<128-element) tail through plain JAX -- no full-array pad.
        main = (total // 128) * 128
        if main == 0:
            return func(x)
        tail = total - main
        lane = next(l for l in _LANE_CHOICES if main % l == 0)
    else:
        main, tail = total, 0

    rows = main // lane
    x2 = (flat[:main] if tail else flat).reshape(rows, lane)

    if rows <= sub:
        tile_r, n_blocks = rows, 1       # single full-extent block
    else:
        # Largest row-tile that keeps a block <= target, sublane-aligned.
        max_tile_r = max(sub, (block_bytes // (lane * itemsize)) // sub * sub)
        n_blocks = pl.cdiv(rows, max_tile_r)
        if num_tc > 1:
            # v7x: give each TensorCore >= 2 grid steps so per-core
            # prefetch/writeback overlaps compute, as long as each block
            # stays >= ~512 KiB.  Single-TC chips never force-split (the
            # grid is a sequential loop there -- pure overhead).
            max_useful = max(1, (rows * lane * itemsize) // _MIN_SPLIT_BLOCK_BYTES)
            n_blocks = max(n_blocks, min(2 * num_tc, max_useful))
        tile_r = max(sub, pl.cdiv(pl.cdiv(rows, n_blocks), sub) * sub)
        # Last block may be ragged (rows % tile_r != 0): Pallas masks it.
        n_blocks = pl.cdiv(rows, tile_r)

    out2 = pl.pallas_call(
        _elementwise_kernel(func),
        out_shape=jax.ShapeDtypeStruct((rows, lane), dtype),
        grid_spec=pl.GridSpec(
            grid=(n_blocks,),
            in_specs=[pl.BlockSpec((tile_r, lane), lambda i: (i, 0))],
            out_specs=pl.BlockSpec((tile_r, lane), lambda i: (i, 0)),
        ),
        # Donate the input buffer to the output: halves HBM footprint (XLA
        # copies if the buffer is still live elsewhere).  In the divisible
        # case this now aliases the caller's buffer, not a padded temporary.
        input_output_aliases={0: 0},
        compiler_params=pltpu.CompilerParams(
            dimension_semantics=("parallel",),
            vmem_limit_bytes=vmem_limit),
        # Advisory: memory-bound streaming op (helps XLA schedule neighbors).
        cost_estimate=pl.CostEstimate(
            flops=2 * main, transcendentals=main,
            bytes_accessed=2 * main * itemsize),
    )(x2)

    out_flat = out2.reshape(-1)
    if tail:
        out_flat = jnp.concatenate(
            [out_flat, func(flat[main:]).astype(dtype)])
    return out_flat.reshape(orig_shape)


# ---------------------------------------------------------------------------
# The module.
# ---------------------------------------------------------------------------
class Lambda:
    """JAX/Pallas port of the PyTorch Lambda(nn.Module): __call__(x) = func(x)."""

    def __init__(self, func, *, min_pallas_bytes=_DEFAULT_MIN_PALLAS_BYTES):
        self.func = func
        self.min_pallas_bytes = min_pallas_bytes
        self._ew_cache = {}   # (shape, dtype) -> bool, avoids re-tracing
        # Jitted hot path so repeated calls with the same shape reuse the
        # compiled pallas_call instead of re-dispatching it eagerly.
        self._pallas_fn = jax.jit(
            functools.partial(_lambda_elementwise_pallas, func))

    def __call__(self, x):
        shape = tuple(jnp.shape(x))
        dtype = jnp.result_type(x)
        nbytes = int(jnp.prod(jnp.array(shape))) * jnp.dtype(dtype).itemsize \
            if shape else jnp.dtype(dtype).itemsize
        # Small-input bypass: pallas_call launch + glue costs multiple us;
        # XLA's fused elementwise loop is already optimal for tiny tensors.
        if nbytes < self.min_pallas_bytes:
            return self.func(x)
        key = (shape, str(dtype))
        is_ew = self._ew_cache.get(key)
        if is_ew is None:
            is_ew = _is_safe_elementwise(self.func, x)
            self._ew_cache[key] = is_ew
        if is_ew:
            # Hot path: verified-elementwise func runs inside the Pallas
            # kernel over a sublane/lane-dense flattened view.
            return self._pallas_fn(x)
        # Shape-changing funcs (e.g. the tutorial's `x.view(x.size(0), -1)`)
        # are metadata-only reshapes, and non-elementwise funcs need
        # cross-element access; both stay as plain-JAX glue for correctness.
        # TODO(synk): pure view/reshape lambdas have no compute to kernelize.
        return self.func(x)


if __name__ == "__main__":
    key = jax.random.PRNGKey(0)
    # NCHW input, matching a PyTorch conv-pipeline tensor.
    x = jax.random.normal(key, (2, 4, 16, 16), dtype=jnp.float32)

    # 1) Elementwise lambda -> runs inside the Pallas kernel.  The demo tensor
    #    is far below the 1 MiB production bypass threshold, so force the
    #    kernel path here to actually exercise it.
    ew_func = lambda v: jnp.tanh(v) * 2.0 + 0.5
    y_ref = ew_func(x)
    lam_ew = Lambda(ew_func, min_pallas_bytes=0)
    y = jax.block_until_ready(lam_ew(x))
    assert y.shape == y_ref.shape and y.dtype == y_ref.dtype
    assert jnp.allclose(y, y_ref, atol=1e-5, rtol=1e-5)

    # 1b) Non-lane-divisible size exercises the prefix/tail split path
    #     (no full-array pad/slice round-trips) and a ragged last block.
    x_odd = jax.random.normal(key, (3, 5, 7, 11), dtype=jnp.float32)
    y_odd = jax.block_until_ready(Lambda(ew_func, min_pallas_bytes=0)(x_odd))
    assert y_odd.shape == x_odd.shape
    assert jnp.allclose(y_odd, ew_func(x_odd), atol=1e-5, rtol=1e-5)

    # 1c) Default threshold: tiny tensor takes the XLA bypass (still correct).
    y_small = jax.block_until_ready(Lambda(ew_func)(x))
    assert jnp.allclose(y_small, y_ref, atol=1e-5, rtol=1e-5)

    # 2) Canonical tutorial lambda: flatten (torch: x.view(x.size(0), -1)).
    flat_func = lambda v: v.reshape(v.shape[0], -1)
    z = jax.block_until_ready(Lambda(flat_func)(x))
    assert z.shape == (2, 4 * 16 * 16)
    assert jnp.allclose(z, x.reshape(2, -1))

    # 3) Shape-preserving but NOT elementwise -> must take the safe fallback
    #    (the jaxpr gate rejects `rev`), and x must be unmodified by aliasing.
    flip_func = lambda v: jnp.flip(v, axis=-1)
    w = jax.block_until_ready(Lambda(flip_func, min_pallas_bytes=0)(x))
    assert jnp.allclose(w, jnp.flip(x, axis=-1))

    print("KERNEL_OK")
</pallas_src>

<mosaic_0001>
module attributes {stable_mosaic.version = 11 : i64} {
  func.func @kernel(%arg0: i32, %arg1: memref<4x512xf32, #tpu.memory_space<vmem>>, %arg2: memref<4x512xf32, #tpu.memory_space<vmem>>) attributes {dimension_semantics = [#tpu.dimension_semantics<parallel>], iteration_bounds = array<i64: 1>, scalar_prefetch = 0 : i64, scratch_operands = 0 : i64, tpu.core_type = #tpu.core_type<tc>, window_params = [{transform_indices = @transform_0, window_bounds = array<i64: 4, 512>}, {transform_indices = @transform_1, window_bounds = array<i64: 4, 512>}]} {
    %c0 = arith.constant 0 : index
    %c0_0 = arith.constant 0 : index
    %0 = vector.load %arg1[%c0, %c0_0] : memref<4x512xf32, #tpu.memory_space<vmem>>, vector<4x512xf32>
    %1 = math.tanh %0 : vector<4x512xf32>
    %cst = arith.constant 2.000000e+00 : f32
    %2 = vector.broadcast %cst : f32 to vector<4x512xf32>
    %3 = arith.mulf %1, %2 : vector<4x512xf32>
    %cst_1 = arith.constant 5.000000e-01 : f32
    %4 = vector.broadcast %cst_1 : f32 to vector<4x512xf32>
    %5 = arith.addf %3, %4 : vector<4x512xf32>
    %c0_2 = arith.constant 0 : index
    %c0_3 = arith.constant 0 : index
    %6 = vector.load %arg2[%c0_2, %c0_3] : memref<4x512xf32, #tpu.memory_space<vmem>>, vector<4x512xf32>
    tpu.vector_store %arg2[%c0_2, %c0_3], %5 {strides = array<i32>} : memref<4x512xf32, #tpu.memory_space<vmem>>, vector<4x512xf32>,
    return
  }
  func.func @transform_0(%arg0: i32) -> (i32, i32) {
    %c0_i32 = arith.constant 0 : i32
    %c0_i32_0 = arith.constant 0 : i32
    return %arg0, %c0_i32 : i32, i32
  }
  func.func @transform_1(%arg0: i32) -> (i32, i32) {
    %c0_i32 = arith.constant 0 : i32
    %c0_i32_0 = arith.constant 0 : i32
    return %arg0, %c0_i32 : i32, i32
  }
}

</mosaic_0001>

<bundles_post_ra>
// kernel: _lambda_elementwise_pallas.1
= control target key start
LH: loop header
LB: loop body
LE: loop exit
PB: predicated region body
PF: predicated region fallthrough
CT: control target
= control target key end

     0   :  { %s48_s0 = inlined_call_operand.vmem [shape: f32[4,512], index: 0, kind: input, shape index: {}, may-alias: {0,1}]   ;;  %s49_s1 = inlined_call_operand.vmem [shape: f32[4,512], index: 1, kind: output, shape index: {}, may-alias: {0,1}]  }
   0x1   :  { %v8_v0 = vld [vmem:[%s48_s0] sm:$0xff]  ;;  %v9_v1 = vld [vmem:[%s48_s0 + $0x8] sm:$0xff] }
   0x2   :  { %22 = vtanh.f32 %v8_v0 }
   0x3   :  { %24 = vtanh.f32 %v9_v1 }
   0xf   :  { %v23_v2 = vpop.eup %22 }
  0x10   :  { %v25_v3 = vpop.eup %24  ;;  %v12_v4 = vmul.f32 2.0, %v23_v2 }
  0x11   :  { %v13_v5 = vmul.f32 2.0, %v25_v3 }
  0x12   :  { %v14_v6 = vadd.f32 0.5, %v12_v4 }
  0x13   :  { %v15_v7 = vadd.f32 0.5, %v13_v5 }
  0x14   :  { %16 = vst [vmem:[%s49_s1] sm:$0xff] %v14_v6 }
  0x15   :  { %17 = vst [vmem:[%s49_s1 + $0x8] sm:$0xff] %v15_v7 }

</bundles_post_ra>
